<compile_context>
chip_gen: v7x
topology: tpu7x:2x2x1
jax: 0.10.0
libtpu: 0.0.40
codegen_flags: <defaults>
</compile_context>

<pallas_src>
import numpy as np

import jax
import jax.numpy as jnp
from jax import lax
from jax.experimental import pallas as pl
from jax.experimental.pallas import tpu as pltpu

BN_EPS = 1e-5          # nn.BatchNorm1d default eps
COS_EPS = 1e-8         # eps guarding the cosine-similarity denominator
LRELU_SLOPE = 0.1      # nn.LeakyReLU(0.1)


def _round_up(n, m):
    return ((n + m - 1) // m) * m


def pack_params(weights, biases):
    """Pack all Linear weights/biases into one f32 slab (pure numpy, host-side).

    Layout (width = max out_features):
      * each weight W_i:(fi,fo) occupies an 8-row-aligned block of rows,
      * each bias b_i:(fo,) occupies row 0 of its own 8-row-aligned slot.
    Returns (slab_device_array, w_meta, bias_rows) where
      w_meta[i]   = (row_start, in_features, out_features)
      bias_rows[i] = row index of bias i.
    """
    width = max(int(w.shape[1]) for w in weights)
    blocks, w_meta, bias_rows = [], [], []
    row = 0
    for w in weights:
        w = np.asarray(w, np.float32)
        fi, fo = int(w.shape[0]), int(w.shape[1])
        nrows = _round_up(fi, 8)
        blk = np.zeros((nrows, width), np.float32)
        blk[:fi, :fo] = w
        blocks.append(blk)
        w_meta.append((row, fi, fo))
        row += nrows
    for b in biases:
        b = np.asarray(b, np.float32).reshape(-1)
        fo = int(b.shape[0])
        blk = np.zeros((8, width), np.float32)     # own 8-row aligned slot
        blk[0, :fo] = b
        blocks.append(blk)
        bias_rows.append(row)
        row += 8
    slab = np.concatenate(blocks, axis=0)
    return jnp.asarray(slab), tuple(w_meta), tuple(bias_rows)


def _make_kernel(w_meta, bias_rows, batch, assume_binary_A):
    inv_b = 1.0 / float(batch)

    def kernel(x_ref, a_ref, p_ref, out_ref):
        x = x_ref[...].astype(jnp.float32)
        a = a_ref[...].astype(jnp.float32)

        # Hoisted once: reduction row used by every BatchNorm (MXU reduction).
        ones_row = jnp.ones((1, batch), jnp.float32)

        def linear(h, idx):
            row, fi, fo = w_meta[idx]
            w = p_ref[row:row + fi, 0:fo]                         # aligned static view
            b = p_ref[bias_rows[idx]:bias_rows[idx] + 1, 0:fo]    # aligned (1, fo) view
            return jnp.dot(h, w, preferred_element_type=jnp.float32) + b

        def bn_lrelu(h):
            # BatchNorm1d (training mode, gamma=1, beta=0); both reductions on
            # the MXU instead of cross-sublane XLU reductions.
            mu = jnp.dot(ones_row, h, preferred_element_type=jnp.float32) * inv_b
            c = h - mu
            var = jnp.dot(ones_row, c * c, preferred_element_type=jnp.float32) * inv_b
            hn = c * lax.rsqrt(var + BN_EPS)
            return jnp.maximum(hn, LRELU_SLOPE * hn)              # LeakyReLU(0.1)

        # ---------------- encoder: (Linear -> BN -> LeakyReLU) x 2 -------------
        h = bn_lrelu(linear(x, 0))
        z = bn_lrelu(linear(h, 1))

        # ---------------- decoder: (Linear -> BN -> LeakyReLU), Linear ---------
        d = bn_lrelu(linear(z, 2))
        x_hat = linear(d, 3)

        # ---- loss_2nd: BCE-with-logits(X_hat, X), sum over dim 1, mean --------
        # stable form: max(x,0) - x*y + log(1 + exp(-|x|))
        bce_logits = (jnp.maximum(x_hat, 0.0) - x_hat * x
                      + jnp.log1p(jnp.exp(-jnp.abs(x_hat))))
        loss_2nd = jnp.sum(bce_logits) * inv_b

        # ---- loss_1st: BCE(clamp(cos_sim(Z,Z),0,1), A) * A, sum dim 1, mean ---
        z_norm = jnp.sqrt(jnp.sum(z * z, axis=1, keepdims=True))          # (B,1)
        zn = z / jnp.maximum(z_norm, COS_EPS)
        # Z @ Z^T without an explicit transpose: contract last axis of both.
        s = lax.dot_general(zn, zn, (((1,), (1,)), ((), ())),
                            preferred_element_type=jnp.float32)           # (B,B)
        s = jnp.clip(s, 0.0, 1.0)
        # PyTorch BCELoss clamps each log term at -100.
        log_s = jnp.maximum(jnp.log(s), -100.0)
        if assume_binary_A:
            # a in {0,1}  =>  BCE(s,a)*a == -a*log(s): drop the log(1-s) pass.
            weighted_bce = -(a * log_s)
        else:
            log_1ms = jnp.maximum(jnp.log(1.0 - s), -100.0)
            weighted_bce = -(a * log_s + (1.0 - a) * log_1ms) * a
        loss_1st = jnp.sum(weighted_bce) * inv_b

        # ---- loss_norm: mean of per-row L2 norms of Z --------------------------
        loss_norm = jnp.sum(z_norm) * inv_b

        # Single zero-filled lane-dense (8,128) output block; losses in row 0,
        # lanes 0..2 -> one unmasked store, one output DMA.
        lane = lax.broadcasted_iota(jnp.int32, (8, 128), 1)
        sub = lax.broadcasted_iota(jnp.int32, (8, 128), 0)
        row0 = sub == 0
        out_ref[...] = (jnp.where(row0 & (lane == 0), loss_2nd, 0.0)
                        + jnp.where(row0 & (lane == 1), loss_1st, 0.0)
                        + jnp.where(row0 & (lane == 2), loss_norm, 0.0))

    return kernel


def make_etna_forward(weights, biases, *, assume_binary_A=True):
    """Pack parameters once and return a jitted forward(X, A) -> 3 losses."""
    slab, w_meta, bias_rows = pack_params(weights, biases)

    def forward(X, A):
        batch = X.shape[0]
        # The model implicitly requires A to match S = cos_sim(Z,Z) : (B, B).
        assert A.shape == (batch, batch), "A must be (batch, batch)"
        kernel = _make_kernel(w_meta, bias_rows, batch, assume_binary_A)
        vmem = pl.BlockSpec(memory_space=pltpu.MemorySpace.VMEM)
        out = pl.pallas_call(
            kernel,
            out_shape=jax.ShapeDtypeStruct((8, 128), jnp.float32),
            in_specs=[vmem, vmem, vmem],
            out_specs=vmem,
        )(X, A, slab)
        return out[0, 0], out[0, 1], out[0, 2]

    return jax.jit(forward)


def xavier_uniform(key, fan_in, fan_out):
    limit = (6.0 / (fan_in + fan_out)) ** 0.5
    return jax.random.uniform(key, (fan_in, fan_out), jnp.float32, -limit, limit)


if __name__ == "__main__":
    # dims = [input_dim] + hidden_layers ; batch == input_dim so that
    # A:(input_dim,input_dim) matches S:(batch,batch), as the reference assumes.
    input_dim = 16
    hidden_layers = [32, 8]
    dims = [input_dim] + hidden_layers           # [16, 32, 8]
    batch = input_dim

    key = jax.random.PRNGKey(0)
    kx, ka, k1, k2, k3, k4 = jax.random.split(key, 6)

    # X is also a BCE target -> values in [0, 1]
    X = jax.random.uniform(kx, (batch, input_dim), jnp.float32)
    # A: binary symmetric adjacency matrix (required for the binary-A fast path)
    A_raw = (jax.random.uniform(ka, (input_dim, input_dim)) < 0.3).astype(jnp.float32)
    A = jnp.clip(A_raw + A_raw.T, 0.0, 1.0)

    # Deterministic parameter init (xavier-uniform weights, zero biases),
    # matching the Linear shapes built in __init__ (stored as (in, out)).
    weights = (
        xavier_uniform(k1, dims[0], dims[1]),   # encoder Linear 1
        xavier_uniform(k2, dims[1], dims[2]),   # encoder Linear 2
        xavier_uniform(k3, dims[2], dims[1]),   # decoder Linear 1
        xavier_uniform(k4, dims[1], dims[0]),   # decoder Linear 2
    )
    biases = (
        jnp.zeros((dims[1],), jnp.float32),
        jnp.zeros((dims[2],), jnp.float32),
        jnp.zeros((dims[1],), jnp.float32),
        jnp.zeros((dims[0],), jnp.float32),
    )

    # Parameters are packed exactly once here; repeated calls reuse the slab
    # and the jit-cached executable.
    etna_forward = make_etna_forward(weights, biases, assume_binary_A=True)

    loss_2nd, loss_1st, loss_norm = etna_forward(X, A)
    jax.block_until_ready((loss_2nd, loss_1st, loss_norm))
    print("loss_2nd =", float(loss_2nd),
          "loss_1st =", float(loss_1st),
          "loss_norm =", float(loss_norm))
    print("KERNEL_OK")
</pallas_src>

<mosaic_0001>
module attributes {stable_mosaic.version = 11 : i64} {
  func.func @kernel(%arg0: memref<16x16xf32, #tpu.memory_space<vmem>>, %arg1: memref<16x16xf32, #tpu.memory_space<vmem>>, %arg2: memref<120x32xf32, #tpu.memory_space<vmem>>, %arg3: memref<8x128xf32, #tpu.memory_space<vmem>>) attributes {dimension_semantics = [], scalar_prefetch = 0 : i64, scratch_operands = 0 : i64, tpu.core_type = #tpu.core_type<tc>} {
    %c0 = arith.constant 0 : index
    %c0_0 = arith.constant 0 : index
    %0 = vector.load %arg0[%c0, %c0_0] : memref<16x16xf32, #tpu.memory_space<vmem>>, vector<16x16xf32>
    %c0_1 = arith.constant 0 : index
    %c0_2 = arith.constant 0 : index
    %1 = vector.load %arg1[%c0_1, %c0_2] : memref<16x16xf32, #tpu.memory_space<vmem>>, vector<16x16xf32>
    %cst = arith.constant 1.000000e+00 : f32
    %2 = vector.broadcast %cst : f32 to vector<1x16xf32>
    %c0_3 = arith.constant 0 : index
    %c0_4 = arith.constant 0 : index
    %3 = vector.load %arg2[%c0_3, %c0_4] : memref<120x32xf32, #tpu.memory_space<vmem>>, vector<16x32xf32>
    %c88 = arith.constant 88 : index
    %c0_5 = arith.constant 0 : index
    %4 = vector.load %arg2[%c88, %c0_5] : memref<120x32xf32, #tpu.memory_space<vmem>>, vector<1x32xf32>
    %cst_6 = arith.constant dense<0.000000e+00> : vector<16x32xf32>
    %5 = tpu.matmul %0, %3, %cst_6 {dimension_numbers = #tpu.dot_dimension_numbers<[1], [0], [0], [1], [0, 0, 1, 1], [], []>} : vector<16x16xf32>, vector<16x32xf32>, vector<16x32xf32> -> vector<16x32xf32>
    %6 = vector.broadcast %4 : vector<1x32xf32> to vector<16x32xf32>
    %7 = arith.addf %5, %6 : vector<16x32xf32>
    %cst_7 = arith.constant dense<0.000000e+00> : vector<1x32xf32>
    %8 = tpu.matmul %2, %7, %cst_7 {dimension_numbers = #tpu.dot_dimension_numbers<[1], [0], [0], [1], [0, 0, 1, 1], [], []>} : vector<1x16xf32>, vector<16x32xf32>, vector<1x32xf32> -> vector<1x32xf32>
    %cst_8 = arith.constant 6.250000e-02 : f32
    %9 = vector.broadcast %cst_8 : f32 to vector<1x32xf32>
    %10 = arith.mulf %8, %9 : vector<1x32xf32>
    %11 = vector.broadcast %10 : vector<1x32xf32> to vector<16x32xf32>
    %12 = arith.subf %7, %11 : vector<16x32xf32>
    %13 = arith.mulf %12, %12 : vector<16x32xf32>
    %cst_9 = arith.constant dense<0.000000e+00> : vector<1x32xf32>
    %14 = tpu.matmul %2, %13, %cst_9 {dimension_numbers = #tpu.dot_dimension_numbers<[1], [0], [0], [1], [0, 0, 1, 1], [], []>} : vector<1x16xf32>, vector<16x32xf32>, vector<1x32xf32> -> vector<1x32xf32>
    %cst_10 = arith.constant 6.250000e-02 : f32
    %15 = vector.broadcast %cst_10 : f32 to vector<1x32xf32>
    %16 = arith.mulf %14, %15 : vector<1x32xf32>
    %cst_11 = arith.constant 9.99999974E-6 : f32
    %17 = vector.broadcast %cst_11 : f32 to vector<1x32xf32>
    %18 = arith.addf %16, %17 : vector<1x32xf32>
    %19 = math.rsqrt %18 : vector<1x32xf32>
    %20 = vector.broadcast %19 : vector<1x32xf32> to vector<16x32xf32>
    %21 = arith.mulf %12, %20 : vector<16x32xf32>
    %cst_12 = arith.constant 1.000000e-01 : f32
    %22 = vector.broadcast %cst_12 : f32 to vector<16x32xf32>
    %23 = arith.mulf %22, %21 : vector<16x32xf32>
    %24 = arith.maximumf %21, %23 : vector<16x32xf32>
    %c16 = arith.constant 16 : index
    %c0_13 = arith.constant 0 : index
    %25 = vector.load %arg2[%c16, %c0_13] : memref<120x32xf32, #tpu.memory_space<vmem>>, vector<32x8xf32>
    %c96 = arith.constant 96 : index
    %c0_14 = arith.constant 0 : index
    %26 = vector.load %arg2[%c96, %c0_14] : memref<120x32xf32, #tpu.memory_space<vmem>>, vector<1x8xf32>
    %cst_15 = arith.constant dense<0.000000e+00> : vector<16x8xf32>
    %27 = tpu.matmul %24, %25, %cst_15 {dimension_numbers = #tpu.dot_dimension_numbers<[1], [0], [0], [1], [0, 0, 1, 1], [], []>} : vector<16x32xf32>, vector<32x8xf32>, vector<16x8xf32> -> vector<16x8xf32>
    %28 = vector.broadcast %26 : vector<1x8xf32> to vector<16x8xf32>
    %29 = arith.addf %27, %28 : vector<16x8xf32>
    %cst_16 = arith.constant dense<0.000000e+00> : vector<1x8xf32>
    %30 = tpu.matmul %2, %29, %cst_16 {dimension_numbers = #tpu.dot_dimension_numbers<[1], [0], [0], [1], [0, 0, 1, 1], [], []>} : vector<1x16xf32>, vector<16x8xf32>, vector<1x8xf32> -> vector<1x8xf32>
    %cst_17 = arith.constant 6.250000e-02 : f32
    %31 = vector.broadcast %cst_17 : f32 to vector<1x8xf32>
    %32 = arith.mulf %30, %31 : vector<1x8xf32>
    %33 = vector.broadcast %32 : vector<1x8xf32> to vector<16x8xf32>
    %34 = arith.subf %29, %33 : vector<16x8xf32>
    %35 = arith.mulf %34, %34 : vector<16x8xf32>
    %cst_18 = arith.constant dense<0.000000e+00> : vector<1x8xf32>
    %36 = tpu.matmul %2, %35, %cst_18 {dimension_numbers = #tpu.dot_dimension_numbers<[1], [0], [0], [1], [0, 0, 1, 1], [], []>} : vector<1x16xf32>, vector<16x8xf32>, vector<1x8xf32> -> vector<1x8xf32>
    %cst_19 = arith.constant 6.250000e-02 : f32
    %37 = vector.broadcast %cst_19 : f32 to vector<1x8xf32>
    %38 = arith.mulf %36, %37 : vector<1x8xf32>
    %cst_20 = arith.constant 9.99999974E-6 : f32
    %39 = vector.broadcast %cst_20 : f32 to vector<1x8xf32>
    %40 = arith.addf %38, %39 : vector<1x8xf32>
    %41 = math.rsqrt %40 : vector<1x8xf32>
    %42 = vector.broadcast %41 : vector<1x8xf32> to vector<16x8xf32>
    %43 = arith.mulf %34, %42 : vector<16x8xf32>
    %cst_21 = arith.constant 1.000000e-01 : f32
    %44 = vector.broadcast %cst_21 : f32 to vector<16x8xf32>
    %45 = arith.mulf %44, %43 : vector<16x8xf32>
    %46 = arith.maximumf %43, %45 : vector<16x8xf32>
    %c48 = arith.constant 48 : index
    %c0_22 = arith.constant 0 : index
    %47 = vector.load %arg2[%c48, %c0_22] : memref<120x32xf32, #tpu.memory_space<vmem>>, vector<8x32xf32>
    %c104 = arith.constant 104 : index
    %c0_23 = arith.constant 0 : index
    %48 = vector.load %arg2[%c104, %c0_23] : memref<120x32xf32, #tpu.memory_space<vmem>>, vector<1x32xf32>
    %cst_24 = arith.constant dense<0.000000e+00> : vector<16x32xf32>
    %49 = tpu.matmul %46, %47, %cst_24 {dimension_numbers = #tpu.dot_dimension_numbers<[1], [0], [0], [1], [0, 0, 1, 1], [], []>} : vector<16x8xf32>, vector<8x32xf32>, vector<16x32xf32> -> vector<16x32xf32>
    %50 = vector.broadcast %48 : vector<1x32xf32> to vector<16x32xf32>
    %51 = arith.addf %49, %50 : vector<16x32xf32>
    %cst_25 = arith.constant dense<0.000000e+00> : vector<1x32xf32>
    %52 = tpu.matmul %2, %51, %cst_25 {dimension_numbers = #tpu.dot_dimension_numbers<[1], [0], [0], [1], [0, 0, 1, 1], [], []>} : vector<1x16xf32>, vector<16x32xf32>, vector<1x32xf32> -> vector<1x32xf32>
    %cst_26 = arith.constant 6.250000e-02 : f32
    %53 = vector.broadcast %cst_26 : f32 to vector<1x32xf32>
    %54 = arith.mulf %52, %53 : vector<1x32xf32>
    %55 = vector.broadcast %54 : vector<1x32xf32> to vector<16x32xf32>
    %56 = arith.subf %51, %55 : vector<16x32xf32>
    %57 = arith.mulf %56, %56 : vector<16x32xf32>
    %cst_27 = arith.constant dense<0.000000e+00> : vector<1x32xf32>
    %58 = tpu.matmul %2, %57, %cst_27 {dimension_numbers = #tpu.dot_dimension_numbers<[1], [0], [0], [1], [0, 0, 1, 1], [], []>} : vector<1x16xf32>, vector<16x32xf32>, vector<1x32xf32> -> vector<1x32xf32>
    %cst_28 = arith.constant 6.250000e-02 : f32
    %59 = vector.broadcast %cst_28 : f32 to vector<1x32xf32>
    %60 = arith.mulf %58, %59 : vector<1x32xf32>
    %cst_29 = arith.constant 9.99999974E-6 : f32
    %61 = vector.broadcast %cst_29 : f32 to vector<1x32xf32>
    %62 = arith.addf %60, %61 : vector<1x32xf32>
    %63 = math.rsqrt %62 : vector<1x32xf32>
    %64 = vector.broadcast %63 : vector<1x32xf32> to vector<16x32xf32>
    %65 = arith.mulf %56, %64 : vector<16x32xf32>
    %cst_30 = arith.constant 1.000000e-01 : f32
    %66 = vector.broadcast %cst_30 : f32 to vector<16x32xf32>
    %67 = arith.mulf %66, %65 : vector<16x32xf32>
    %68 = arith.maximumf %65, %67 : vector<16x32xf32>
    %c56 = arith.constant 56 : index
    %c0_31 = arith.constant 0 : index
    %69 = vector.load %arg2[%c56, %c0_31] : memref<120x32xf32, #tpu.memory_space<vmem>>, vector<32x16xf32>
    %c112 = arith.constant 112 : index
    %c0_32 = arith.constant 0 : index
    %70 = vector.load %arg2[%c112, %c0_32] : memref<120x32xf32, #tpu.memory_space<vmem>>, vector<1x16xf32>
    %cst_33 = arith.constant dense<0.000000e+00> : vector<16x16xf32>
    %71 = tpu.matmul %68, %69, %cst_33 {dimension_numbers = #tpu.dot_dimension_numbers<[1], [0], [0], [1], [0, 0, 1, 1], [], []>} : vector<16x32xf32>, vector<32x16xf32>, vector<16x16xf32> -> vector<16x16xf32>
    %72 = vector.broadcast %70 : vector<1x16xf32> to vector<16x16xf32>
    %73 = arith.addf %71, %72 : vector<16x16xf32>
    %cst_34 = arith.constant 0.000000e+00 : f32
    %74 = vector.broadcast %cst_34 : f32 to vector<16x16xf32>
    %75 = arith.maximumf %73, %74 : vector<16x16xf32>
    %76 = arith.mulf %73, %0 : vector<16x16xf32>
    %77 = arith.subf %75, %76 : vector<16x16xf32>
    %78 = math.absf %73 : vector<16x16xf32>
    %cst_35 = arith.constant 0.000000e+00 : f32
    %79 = vector.broadcast %cst_35 : f32 to vector<16x16xf32>
    %80 = arith.subf %79, %78 : vector<16x16xf32>
    %81 = math.exp %80 : vector<16x16xf32>
    %82 = math.log1p %81 : vector<16x16xf32>
    %83 = arith.addf %77, %82 : vector<16x16xf32>
    %84 = vector.shape_cast %83 : vector<16x16xf32> to vector<1x16x16xf32>
    %cst_36 = arith.constant dense<0.000000e+00> : vector<1xf32>
    %85 = vector.multi_reduction <add>, %84, %cst_36 [1, 2] : vector<1x16x16xf32> to vector<1xf32>
    %86 = vector.shape_cast %85 : vector<1xf32> to vector<1x1x1xf32>
    %87 = vector.extract %86[0, 0, 0] : f32 from vector<1x1x1xf32>
    %cst_37 = arith.constant 6.250000e-02 : f32
    %88 = arith.mulf %87, %cst_37 : f32
    %89 = arith.mulf %46, %46 : vector<16x8xf32>
    %cst_38 = arith.constant dense<0.000000e+00> : vector<16xf32>
    %90 = vector.multi_reduction <add>, %89, %cst_38 [1] : vector<16x8xf32> to vector<16xf32>
    %91 = vector.shape_cast %90 : vector<16xf32> to vector<16x1xf32>
    %92 = math.sqrt %91 : vector<16x1xf32>
    %cst_39 = arith.constant 9.99999993E-9 : f32
    %93 = vector.broadcast %cst_39 : f32 to vector<16x1xf32>
    %94 = arith.maximumf %92, %93 : vector<16x1xf32>
    %95 = vector.broadcast %94 : vector<16x1xf32> to vector<16x8xf32>
    %96 = arith.divf %46, %95 : vector<16x8xf32>
    %cst_40 = arith.constant dense<0.000000e+00> : vector<16x16xf32>
    %97 = tpu.matmul %96, %96, %cst_40 {dimension_numbers = #tpu.dot_dimension_numbers<[1], [1], [0], [0], [0, 0, 1, 0], [], []>} : vector<16x8xf32>, vector<16x8xf32>, vector<16x16xf32> -> vector<16x16xf32>
    %cst_41 = arith.constant 0.000000e+00 : f32
    %cst_42 = arith.constant 1.000000e+00 : f32
    %98 = vector.broadcast %cst_41 : f32 to vector<16x16xf32>
    %99 = arith.maximumf %98, %97 : vector<16x16xf32>
    %100 = vector.broadcast %cst_42 : f32 to vector<16x16xf32>
    %101 = arith.minimumf %100, %99 : vector<16x16xf32>
    %102 = math.log %101 : vector<16x16xf32>
    %cst_43 = arith.constant -1.000000e+02 : f32
    %103 = vector.broadcast %cst_43 : f32 to vector<16x16xf32>
    %104 = arith.maximumf %102, %103 : vector<16x16xf32>
    %105 = arith.mulf %1, %104 : vector<16x16xf32>
    %cst_44 = arith.constant 0.000000e+00 : f32
    %106 = vector.broadcast %cst_44 : f32 to vector<16x16xf32>
    %107 = arith.subf %106, %105 : vector<16x16xf32>
    %108 = vector.shape_cast %107 : vector<16x16xf32> to vector<1x16x16xf32>
    %cst_45 = arith.constant dense<0.000000e+00> : vector<1xf32>
    %109 = vector.multi_reduction <add>, %108, %cst_45 [1, 2] : vector<1x16x16xf32> to vector<1xf32>
    %110 = vector.shape_cast %109 : vector<1xf32> to vector<1x1x1xf32>
    %111 = vector.extract %110[0, 0, 0] : f32 from vector<1x1x1xf32>
    %cst_46 = arith.constant 6.250000e-02 : f32
    %112 = arith.mulf %111, %cst_46 : f32
    %113 = vector.shape_cast %92 : vector<16x1xf32> to vector<1x16x1xf32>
    %cst_47 = arith.constant dense<0.000000e+00> : vector<1xf32>
    %114 = vector.multi_reduction <add>, %113, %cst_47 [1, 2] : vector<1x16x1xf32> to vector<1xf32>
    %115 = vector.shape_cast %114 : vector<1xf32> to vector<1x1x1xf32>
    %116 = vector.extract %115[0, 0, 0] : f32 from vector<1x1x1xf32>
    %cst_48 = arith.constant 6.250000e-02 : f32
    %117 = arith.mulf %116, %cst_48 : f32
    %118 = tpu.iota {dimensions = array<i32: 1>} : vector<8x128xi32>
    %119 = tpu.iota {dimensions = array<i32: 0>} : vector<8x128xi32>
    %c0_i32 = arith.constant 0 : i32
    %120 = vector.broadcast %c0_i32 : i32 to vector<8x128xi32>
    %121 = arith.cmpi eq, %119, %120 : vector<8x128xi32>
    %c0_i32_49 = arith.constant 0 : i32
    %122 = vector.broadcast %c0_i32_49 : i32 to vector<8x128xi32>
    %123 = arith.cmpi eq, %118, %122 : vector<8x128xi32>
    %124 = arith.andi %121, %123 : vector<8x128xi1>
    %cst_50 = arith.constant 0.000000e+00 : f32
    %125 = vector.broadcast %88 : f32 to vector<8x128xf32>
    %126 = vector.broadcast %cst_50 : f32 to vector<8x128xf32>
    %127 = arith.select %124, %125, %126 : vector<8x128xi1>, vector<8x128xf32>
    %c1_i32 = arith.constant 1 : i32
    %128 = vector.broadcast %c1_i32 : i32 to vector<8x128xi32>
    %129 = arith.cmpi eq, %118, %128 : vector<8x128xi32>
    %130 = arith.andi %121, %129 : vector<8x128xi1>
    %cst_51 = arith.constant 0.000000e+00 : f32
    %131 = vector.broadcast %112 : f32 to vector<8x128xf32>
    %132 = vector.broadcast %cst_51 : f32 to vector<8x128xf32>
    %133 = arith.select %130, %131, %132 : vector<8x128xi1>, vector<8x128xf32>
    %134 = arith.addf %127, %133 : vector<8x128xf32>
    %c2_i32 = arith.constant 2 : i32
    %135 = vector.broadcast %c2_i32 : i32 to vector<8x128xi32>
    %136 = arith.cmpi eq, %118, %135 : vector<8x128xi32>
    %137 = arith.andi %121, %136 : vector<8x128xi1>
    %cst_52 = arith.constant 0.000000e+00 : f32
    %138 = vector.broadcast %117 : f32 to vector<8x128xf32>
    %139 = vector.broadcast %cst_52 : f32 to vector<8x128xf32>
    %140 = arith.select %137, %138, %139 : vector<8x128xi1>, vector<8x128xf32>
    %141 = arith.addf %134, %140 : vector<8x128xf32>
    %c0_53 = arith.constant 0 : index
    %c0_54 = arith.constant 0 : index
    %142 = vector.load %arg3[%c0_53, %c0_54] : memref<8x128xf32, #tpu.memory_space<vmem>>, vector<8x128xf32>
    tpu.vector_store %arg3[%c0_53, %c0_54], %141 {strides = array<i32>} : memref<8x128xf32, #tpu.memory_space<vmem>>, vector<8x128xf32>,
    return
  }
}

</mosaic_0001>

<bundles_post_ra>
// kernel: forward.1
= control target key start
LH: loop header
LB: loop body
LE: loop exit
PB: predicated region body
PF: predicated region fallthrough
CT: control target
= control target key end

     0   :  { %8 = vsyncpa [#allocation3], 0  ;;  %s1584_s0 = inlined_call_operand.hbm [shape: f32[16,16], index: 0, kind: input, shape index: {}]   ;;  %s1585_s1 = inlined_call_operand.hbm [shape: f32[16,16], index: 1, kind: input, shape index: {}]   ;;  %s1586_s2 = inlined_call_operand.hbm [shape: f32[120,32], index: 2, kind: input, shape index: {}]   ;;  %s1587_s3 = inlined_call_operand.vmem [shape: f32[8,128], index: 3, kind: output, shape index: {}]  }
   0x1   :  { %9 = vsyncpa [#allocation5], 0  ;;  %s1430_s12 = smov [#allocation4]   ;;  %s1431_s14 = smov [#allocation2]  }
   0x2   :  { %s27_s13 = sshll.u32 %s1430_s12, 4  ;;  %s15_s15 = sshll.u32 %s1431_s14, 4  ;;  %s28_s13 = int_to_ptr.vmem [resolvable:$true] %s27_s13  ;;  %s1459_s15 = int_to_ptr.vmem [resolvable:$true] %s15_s15 }
   0x3   :  { %s1360_s18 = scalar_lea.hbm %s1585_s1, 256 }
   0x4   :  { %p1361_p0 = scmp.ne.s32.totalorder %s1585_s1, %s1360_s18  ;;  %p1364_p1 = scmp.lt.u32.totalorder %s1360_s18, %s1585_s1 }
   0x6   :  { %p1366_p2 = pnand %p1364_p1, %p1361_p0 }
   0x8   :  { %1369 = shalt.err (!%p1366_p2)
}
   0x9   :  { %s1370_s23 = scalar_lea.vmem %s28_s13, 256  ;;  %p1375_p4 = scmp.lt.s32.totalorder %s28_s13, %s28_s13 }
   0xa   :  { %p1371_p3 = scmp.ne.s32.totalorder %s28_s13, %s1370_s23  ;;  %p1376_p5 = scmp.lt.s32.totalorder %s1370_s23, %s1370_s23 }
   0xc   :  { %p1377_p6 = por %p1376_p5, %p1375_p4 }
   0xe   :  { %p1378_p7 = pnand %p1377_p6, %p1371_p3 }
  0x10   :  { %1381 = shalt.err (!%p1378_p7)
}
  0x11   :  { %s1432_s24 = smov 128   ;;  %s1433_s25 = smov 8  }
  0x12   :  { %33 = dma.hbm_to_vmem [thread:$0]  %s1585_s1, 256, %s28_s13, [#allocation5], %s1432_s24, %s1432_s24, %s1433_s25  }
  0x13   :  { %s1382_s30 = scalar_lea.hbm %s1584_s0, 256 }
  0x14   :  { %p1383_p8 = scmp.ne.s32.totalorder %s1584_s0, %s1382_s30  ;;  %p1386_p9 = scmp.lt.u32.totalorder %s1382_s30, %s1584_s0 }
  0x16   :  { %p1388_p10 = pnand %p1386_p9, %p1383_p8 }
  0x18   :  { %1391 = shalt.err (!%p1388_p10)
}
  0x19   :  { %s1392_s8 = scalar_lea.vmem %s1459_s15, 256  ;;  %p1397_p12 = scmp.lt.s32.totalorder %s1459_s15, %s1459_s15 }
  0x1a   :  { %p1393_p11 = scmp.ne.s32.totalorder %s1459_s15, %s1392_s8  ;;  %p1398_p13 = scmp.lt.s32.totalorder %s1392_s8, %s1392_s8 }
  0x1c   :  { %p1399_p0 = por %p1398_p13, %p1397_p12 }
  0x1e   :  { %p1400_p1 = pnand %p1399_p0, %p1393_p11 }
  0x20   :  { %1403 = shalt.err (!%p1400_p1)
}
  0x21   :  { %21 = dma.hbm_to_vmem [thread:$0]  %s1584_s0, 256, %s1459_s15, [#allocation3], %s1432_s24, %s1432_s24, %s1433_s25  }
  0x22   :  { %s1434_s10 = smov [#allocation6]   ;;  %s1404_s14 = scalar_lea.hbm %s1586_s2, 1920 }
  0x23   :  { %s39_s11 = sshll.u32 %s1434_s10, 4  ;;  %p1405_p2 = scmp.ne.s32.totalorder %s1586_s2, %s1404_s14  ;;  %s40_s11 = int_to_ptr.vmem [resolvable:$true] %s39_s11 }
  0x24   :  { %p1408_p3 = scmp.lt.u32.totalorder %s1404_s14, %s1586_s2 }
  0x26   :  { %p1410_p4 = pnand %p1408_p3, %p1405_p2 }
  0x28   :  { %1413 = shalt.err (!%p1410_p4)
}
  0x29   :  { %s1414_s20 = scalar_lea.vmem %s40_s11, 1920  ;;  %p1419_p6 = scmp.lt.s32.totalorder %s40_s11, %s40_s11 }
  0x2a   :  { %p1415_p5 = scmp.ne.s32.totalorder %s40_s11, %s1414_s20  ;;  %p1420_p7 = scmp.lt.s32.totalorder %s1414_s20, %s1414_s20 }
  0x2c   :  { %p1421_p8 = por %p1420_p7, %p1419_p6 }
  0x2e   :  { %p1422_p9 = pnand %p1421_p8, %p1415_p5 }
  0x30   :  { %1425 = shalt.err (!%p1422_p9)
}
  0x31   :  { %45 = dma.hbm_to_vmem [thread:$0]  %s1586_s2, 1920, %s40_s11, [#allocation5], %s1432_s24, %s1432_s24, %s1433_s25  }
  0x32   :  { %1426 = dma.done.wait [#allocation3], 256  }
  0x33   :  { %1427 = vsyncadd [#allocation3], 4294967040 }
  0x34   :  { %1428 = dma.done.wait [#allocation5], 2176  }
  0x35   :  { %1429 = vsyncadd [#allocation5], 4294965120  ;;  %vm66_vm0 = vcmask 130048   ;;  %v59_v0 = vld [vmem:[#allocation6] sm:$0xff]  ;;  %v60_v1 = vld [vmem:[#allocation6 + $0x8] sm:$0xff]  ;;  %v1435_v5 = vmov 0.0|0.0   ;;  %v222_v14 = vlaneseq }
  0x36   :  { %v1511_v2 = vld [vmem:[#allocation2] sm:$0xff]  ;;  %v1275_v3 = vpack.c.bf16 %v60_v1, %v59_v0  ;;  %v1515_v4 = vld [vmem:[#allocation2 + $0x8] sm:$0xff]  ;;  %1279 = vmatprep.subr.bf16.mxu1 %v1435_v5  ;;  %vm1436_vm1 = vmmov 0   ;;  %v1437_v6 = vmov 0.0   ;;  %v1129_v7 = vld [vmem:[#allocation6 + $0x58] ss:$0 sm:$0xff] }
  0x37   :  { %1196 = vmatprep.mubr.msk.f32.mxu0 %vm66_vm0, %v1511_v2  ;;  %1203 = vmatprep.mubr.msk.f32.mxu1 %vm1436_vm1, %v1437_v6  ;;  %v1438_v13 = vmov 1.0   ;;  %v1528_v15 = vshrl.u32 %v222_v14, 7  ;;  %v313_v26 = vld [vmem:[#allocation6 + $0x10] sm:$0xff]  ;;  %v314_v27 = vld [vmem:[#allocation6 + $0x18] sm:$0xff]  ;;  %v315_v28 = vld [vmem:[#allocation6 + $0x20] sm:$0xff]  ;;  %vm322_vm2 = vcmask 261120  }
  0x38   :  { %1276 = vmatprep.subr.bf16.mxu0 %v1275_v3  ;;  %v1285_v29 = vpack.c.bf16 %v314_v27, %v313_v26  ;;  %v316_v30 = vld [vmem:[#allocation6 + $0x28] sm:$0xff]  ;;  %v1134_v44 = vld [vmem:[#allocation6 + $0x60] ss:$0 sm:$0xff]  ;;  %v566_v59 = vld [vmem:[#allocation6 + $0x30] sm:$0xff]  ;;  %vm572_vm3 = vcmask 64512   ;;  %vm1089_vm7 = vcmask 7168  }
  0x39   :  { %1278 = vmatpush3.bf16.msra.mxu0 %v1275_v3  ;;  %v1531_v16 = vsub.s32 0, %v1528_v15  ;;  %v1289_v31 = vpack.c.bf16 %v316_v30, %v315_v28  ;;  %vm1314_vm9 = vmpackc.low %vm572_vm3, %vm572_vm3  ;;  %vm1107_vm12 = vcmp.eq.s32.totalorder %v1528_v15, 0 }
  0x3a   :  { %1282 = vmatprep.subr.bf16.mxu0 %v1435_v5 }
  0x3c   :  { %1197 = vmatmul.mubr.msk.f32.vlgmr.msra.gmra.mrb[0].mxu0 %vm66_vm0, %v1515_v4 }
  0x3d   :  { %1210 = vmatprep.mubr.msk.f32.mxu0 %vm1436_vm1, %v1437_v6 }
 0x10f   :  { %v1198_v8 = vpop.f32.mrb[0].mxu0 }
 0x110   :  { %v145_v9 = vadd.f32 %v1198_v8, %v1129_v7  ;;  %v139_v10 = vpop.f32.mrb[1].mxu0 }
 0x111   :  { %v140_v11 = vadd.f32 %v1129_v7, %v139_v10 }
 0x113   :  { %v1280_v12 = vpack.c.bf16 %v145_v9, %v140_v11 }
 0x115   :  { %1281 = vmatpush3.bf16.msra.mxu1 %v1280_v12 }
 0x116   :  { %1286 = vmatprep.subr.bf16.mxu1 %v1285_v29 }
 0x118   :  { %1204 = vmatmul.mubr.msk.f32.vlgmr.msra.gmra.mrb[0].mxu1 %vm66_vm0, %v1438_v13 }
 0x119   :  { %1288 = vmatpush3.bf16.msra.mxu1 %v1285_v29 }
 0x11a   :  { %1290 = vmatprep.subr.bf16.mxu1 %v1289_v31 }
 0x11d   :  { %1292 = vmatpush3.bf16.msra.mxu1 %v1289_v31 }
 0x11e   :  { %1238 = vmatprep.subr.mxu1 %v566_v59 }
 0x1eb   :  { %v217_v17 = vpop.f32.mrb[0].mxu1 }
 0x1ec   :  { %v221_v18 = vmul.f32 0.0625, %v217_v17  ;;  %v1205_v19 = vpop.f32.mrb[1].mxu1 }
 0x1ee   :  { %v225_v20 = vrot.slane %v221_v18, %v1531_v16 }
 0x1f0   :  { %v226_v21 = vsub.f32 %v140_v11, %v225_v20  ;;  %v227_v22 = vsub.f32 %v145_v9, %v225_v20 }
 0x1f2   :  { %v228_v23 = vmul.f32 %v226_v21, %v226_v21  ;;  %v229_v24 = vmul.f32 %v227_v22, %v227_v22 }
 0x1f4   :  { %v1283_v25 = vpack.c.bf16 %v229_v24, %v228_v23 }
 0x1f6   :  { %1284 = vmatpush3.bf16.msra.mxu0 %v1283_v25 }
 0x1f7   :  { %1293 = vmatprep.subr.bf16.mxu0 %v1435_v5 }
 0x1f9   :  { %1211 = vmatmul.mubr.msk.f32.vlgmr.msra.gmra.mrb[2].mxu0 %vm66_vm0, %v1438_v13 }
 0x1fa   :  { %1228 = vmatprep.mubr.msk.f32.mxu0 %vm1436_vm1, %v1437_v6 }
 0x2cc   :  { %v296_v32 = vpop.f32.mrb[2].mxu0 }
 0x2cd   :  { %v300_v33 = vmul.f32 0.0625, %v296_v32  ;;  %v1212_v34 = vpop.f32.mrb[3].mxu0 }
 0x2cf   :  { %v301_v35 = vadd.f32 1e-05, %v300_v33 }
 0x2d1   :  { %1334 = vrsqrt.f32 %v301_v35 }
 0x2db   :  { %v1335_v36 = vpop.eup %1334 }
 0x2dc   :  { %v306_v37 = vrot.slane %v1335_v36, %v1531_v16 }
 0x2de   :  { %v307_v38 = vmul.f32 %v306_v37, %v226_v21  ;;  %v308_v39 = vmul.f32 %v306_v37, %v227_v22 }
 0x2e0   :  { %v309_v40 = vmul.f32 0.1, %v307_v38  ;;  %v310_v41 = vmul.f32 0.1, %v308_v39 }
 0x2e2   :  { %v311_v42 = vmax.f32 %v307_v38, %v309_v40  ;;  %v312_v43 = vmax.f32 %v308_v39, %v310_v41  ;;  %v1139_v40 = vld [vmem:[#allocation6 + $0x68] ss:$0 sm:$0xff] }
 0x2e4   :  { %1221 = vmatprep.mubr.msk.f32.mxu1 %vm322_vm2, %v311_v42 }
 0x2e5   :  { %1222 = vmatmul.mubr.msk.f32.vlgmr.msra.gmra.mrb[2].mxu1 %vm322_vm2, %v312_v43 }
 0x2e6   :  { %1239 = vmatpush3.msra.mxu1 %v566_v59  ;;  %v819_v59 = vld [vmem:[#allocation6 + $0x50] sm:$0xff] }
 0x2e7   :  { %1302 = vmatprep.subr.bf16.mxu1 %v1435_v5 }
 0x3b8   :  { %v1223_v45 = vpop.f32.mrb[2].mxu1 }
 0x3b9   :  { %v401_v46 = vadd.f32 %v1223_v45, %v1134_v44  ;;  %v395_v47 = vpop.f32.mrb[3].mxu1 }
 0x3ba   :  { %v396_v48 = vadd.f32 %v1134_v44, %v395_v47 }
 0x3bc   :  { %v1294_v49 = vpack.c.bf16 %v401_v46, %v396_v48 }
 0x3be   :  { %1295 = vmatpush3.bf16.msra.mxu0 %v1294_v49 }
 0x3bf   :  { %1296 = vmatprep.subr.bf16.mxu0 %v1435_v5 }
 0x3c1   :  { %1229 = vmatmul.mubr.msk.f32.vlgmr.msra.gmra.mrb[4].mxu0 %vm66_vm0, %v1438_v13 }
 0x3c2   :  { %1235 = vmatprep.mubr.msk.f32.mxu0 %vm1436_vm1, %v1437_v6 }
 0x494   :  { %v470_v50 = vpop.f32.mrb[4].mxu0 }
 0x495   :  { %v474_v51 = vmul.f32 0.0625, %v470_v50  ;;  %v1230_v52 = vpop.f32.mrb[5].mxu0 }
 0x497   :  { %v478_v53 = vrot.slane %v474_v51, %v1531_v16 }
 0x499   :  { %v479_v54 = vsub.f32 %v396_v48, %v478_v53  ;;  %v480_v55 = vsub.f32 %v401_v46, %v478_v53 }
 0x49b   :  { %v481_v56 = vmul.f32 %v479_v54, %v479_v54  ;;  %v482_v57 = vmul.f32 %v480_v55, %v480_v55 }
 0x49d   :  { %v1297_v58 = vpack.c.bf16 %v482_v57, %v481_v56  ;;  %v817_v56 = vld [vmem:[#allocation6 + $0x40] sm:$0xff] }
 0x49f   :  { %1298 = vmatpush3.bf16.msra.mxu0 %v1297_v58  ;;  %v818_v58 = vld [vmem:[#allocation6 + $0x48] sm:$0xff] }
 0x4a0   :  { %1299 = vmatprep.subr.bf16.mxu0 %v1435_v5 }
 0x4a2   :  { %1236 = vmatmul.mubr.msk.f32.vlgmr.msra.gmra.mrb[6].mxu0 %vm66_vm0, %v1438_v13 }
 0x4a3   :  { %1247 = vmatprep.mubr.msk.f32.mxu0 %vm1436_vm1, %v1437_v6 }
 0x575   :  { %v549_v60 = vpop.f32.mrb[6].mxu0 }
 0x576   :  { %v553_v61 = vmul.f32 0.0625, %v549_v60  ;;  %v1237_v62 = vpop.f32.mrb[7].mxu0  ;;  %v1309_v60 = vpack.c.bf16 %v819_v59, %v818_v58 }
 0x578   :  { %v554_v63 = vadd.f32 1e-05, %v553_v61 }
 0x57a   :  { %1336 = vrsqrt.f32 %v554_v63 }
 0x584   :  { %v1337_v0 = vpop.eup %1336 }
 0x585   :  { %v559_v1 = vrot.slane %v1337_v0, %v1531_v16 }
 0x587   :  { %v560_v3 = vmul.f32 %v559_v1, %v479_v54  ;;  %v561_v7 = vmul.f32 %v559_v1, %v480_v55  ;;  %v816_v55 = vld [vmem:[#allocation6 + $0x38] sm:$0xff] }
 0x588   :  { %v1305_v57 = vpack.c.bf16 %v817_v56, %v816_v55 }
 0x589   :  { %v562_v8 = vmul.f32 0.1, %v560_v3  ;;  %v563_v9 = vmul.f32 0.1, %v561_v7 }
 0x58b   :  { %v564_v10 = vmax.f32 %v560_v3, %v562_v8  ;;  %v565_v11 = vmax.f32 %v561_v7, %v563_v9 }
 0x58d   :  { %1240 = vmatprep.mubr.msk.f32.mxu1 %vm572_vm3, %v564_v10  ;;  %v953_v12 = vmul.f32 %v564_v10, %v564_v10  ;;  %v954_v17 = vmul.f32 %v565_v11, %v565_v11 }
 0x58e   :  { %1241 = vmatmul.mubr.msk.f32.vlgmr.msra.gmra.mrb[4].mxu1 %vm572_vm3, %v565_v11 }
 0x58f   :  { %v955_v5 = vsel %vm572_vm3, %v953_v12, 0.0  ;;  %1254 = vmatprep.mubr.msk.f32.mxu1 %vm1436_vm1, %v1437_v6  ;;  %v958_v18 = vsel %vm572_vm3, %v954_v17, 0.0 }
 0x590   :  { %956 = vadd.xlane.f32.xlu0 %v955_v5 }
 0x594   :  { %959 = vadd.xlane.f32.xlu0 %v958_v18 }
 0x61d   :  { %v957_v19 = vpop.xlane.xlu0 %956 }
 0x61e   :  { %1338 = vrsqrt.f32 %v957_v19  ;;  %vm963_vm4 = vcmp.eq.f32.partialorder %v957_v19, inf  ;;  %v966_v23 = vand.u32 2147483648, %v957_v19  ;;  %vm965_vm5 = vcmp.eq.f32.partialorder %v957_v19, 0.0 }
 0x621   :  { %v960_v20 = vpop.xlane.xlu0 %959 }
 0x622   :  { %1340 = vrsqrt.f32 %v960_v20  ;;  %vm970_vm6 = vcmp.eq.f32.partialorder %v960_v20, inf  ;;  %v973_v6 = vand.u32 2147483648, %v960_v20  ;;  %vm972_vm8 = vcmp.eq.f32.partialorder %v960_v20, 0.0 }
 0x628   :  { %v1339_v21 = vpop.eup %1338 }
 0x629   :  { %v962_v22 = vmul.f32 %v1339_v21, %v957_v19 }
 0x62b   :  { %v964_v24 = vsel %vm963_vm4, %v957_v19, %v962_v22 }
 0x62c   :  { %v1341_v25 = vpop.eup %1340  ;;  %v967_v26 = vsel %vm965_vm5, %v966_v23, %v964_v24 }
 0x62d   :  { %v969_v27 = vmul.f32 %v1341_v25, %v960_v20  ;;  %v975_v28 = vmax.f32 %v967_v26, 1e-08  ;;  %v1090_v31 = vsel %vm1089_vm7, %v967_v26, 0.0  ;;  %v58_v25 = vld [vmem:[#allocation4 + $0x8] sm:$0xff] }
 0x62f   :  { %v971_v29 = vsel %vm970_vm6, %v960_v20, %v969_v27  ;;  %1342 = vrcp.f32 %v975_v28 }
 0x630   :  { %v974_v30 = vsel %vm972_vm8, %v973_v6, %v971_v29 }
 0x631   :  { %v1091_v32 = vsel %vm1089_vm7, %v974_v30, 0.0  ;;  %v976_v33 = vmax.f32 %v974_v30, 1e-08 }
 0x632   :  { %v1092_v34 = vadd.f32 %v1091_v32, %v1090_v31 }
 0x633   :  { %1344 = vrcp.f32 %v976_v33 }
 0x634   :  { %1093 = vadd.xlane.f32.xlu0 %v1092_v34  ;;  %v1144_v34 = vld [vmem:[#allocation6 + $0x70] ss:$0 sm:$0xff] }
 0x639   :  { %v1343_v35 = vpop.eup %1342 }
 0x63a   :  { %v978_v37 = vmul.f32 %v1343_v35, %v564_v10 }
 0x63d   :  { %v1345_v36 = vpop.eup %1344 }
 0x63e   :  { %v980_v38 = vmul.f32 %v1345_v36, %v565_v11 }
 0x640   :  { %v1313_v39 = vpack.c.bf16 %v980_v38, %v978_v37 }
 0x661   :  { %v1242_v41 = vpop.f32.mrb[4].mxu1 }
 0x662   :  { %v651_v42 = vadd.f32 %v1242_v41, %v1139_v40  ;;  %v645_v43 = vpop.f32.mrb[5].mxu1 }
 0x663   :  { %v646_v44 = vadd.f32 %v1139_v40, %v645_v43 }
 0x665   :  { %v1300_v45 = vpack.c.bf16 %v651_v42, %v646_v44 }
 0x667   :  { %1301 = vmatpush3.bf16.msra.mxu0 %v1300_v45 }
 0x668   :  { %1306 = vmatprep.subr.bf16.mxu0 %v1305_v57 }
 0x66a   :  { %1248 = vmatmul.mubr.msk.f32.vlgmr.msra.gmra.mrb[8].mxu0 %vm66_vm0, %v1438_v13 }
 0x66b   :  { %1308 = vmatpush3.bf16.msra.mxu0 %v1305_v57 }
 0x66c   :  { %1310 = vmatprep.subr.bf16.mxu0 %v1309_v60 }
 0x66f   :  { %1312 = vmatpush3.bf16.msra.mxu0 %v1309_v60 }
 0x73d   :  { %v720_v46 = vpop.f32.mrb[8].mxu0 }
 0x73e   :  { %v724_v47 = vmul.f32 0.0625, %v720_v46  ;;  %v1249_v48 = vpop.f32.mrb[9].mxu0 }
 0x740   :  { %v728_v49 = vrot.slane %v724_v47, %v1531_v16 }
 0x742   :  { %v729_v50 = vsub.f32 %v646_v44, %v728_v49  ;;  %v730_v51 = vsub.f32 %v651_v42, %v728_v49 }
 0x744   :  { %v731_v52 = vmul.f32 %v729_v50, %v729_v50  ;;  %v732_v53 = vmul.f32 %v730_v51, %v730_v51 }
 0x746   :  { %v1303_v54 = vpack.c.bf16 %v732_v53, %v731_v52 }
 0x748   :  { %1304 = vmatpush3.bf16.msra.mxu1 %v1303_v54 }
 0x749   :  { %1315 = vmatprep.subr.msk.bf16.mxu1 %vm1314_vm9, %v1313_v39 }
 0x74b   :  { %1255 = vmatmul.mubr.msk.f32.vlgmr.msra.gmra.mrb[6].mxu1 %vm66_vm0, %v1438_v13 }
 0x74c   :  { %1272 = vmatprep.mubr.msk.f32.mxu1 %vm572_vm3, %v978_v37 }
 0x751   :  { %1318 = vmatpush3.bf16.xpose.msk.msra.mxu1 %vm1314_vm9, %v1313_v39 }
 0x758   :  { %1273 = vmatmul.mubr.msk.f32.vlgmr.msra.gmra.mrb[8].mxu1 %vm572_vm3, %v980_v38 }
 0x81e   :  { %v799_v61 = vpop.f32.mrb[6].mxu1 }
 0x81f   :  { %v803_v62 = vmul.f32 0.0625, %v799_v61  ;;  %v1256_v63 = vpop.f32.mrb[7].mxu1 }
 0x821   :  { %v804_v0 = vadd.f32 1e-05, %v803_v62 }
 0x823   :  { %1346 = vrsqrt.f32 %v804_v0 }
 0x82b   :  { %v1274_v13 = vpop.f32.mrb[8].mxu1 }
 0x82c   :  { %v1063_v1 = vmax.f32 %v1274_v13, 0.0  ;;  %v1053_v3 = vpop.f32.mrb[9].mxu1 }
 0x82d   :  { %v1347_v7 = vpop.eup %1346  ;;  %v1062_v8 = vmax.f32 %v1053_v3, 0.0 }
 0x82e   :  { %v1065_v9 = vmin.f32 %v1063_v1, 1.0  ;;  %v809_v10 = vrot.slane %v1347_v7, %v1531_v16  ;;  %v57_v16 = vld [vmem:[#allocation4] sm:$0xff] }
 0x82f   :  { %v1064_v11 = vmin.f32 %v1062_v8, 1.0 }
 0x830   :  { %1348 = vlog2.f32 %v1065_v9  ;;  %v810_v12 = vmul.f32 %v809_v10, %v729_v50  ;;  %v811_v5 = vmul.f32 %v809_v10, %v730_v51 }
 0x831   :  { %1350 = vlog2.f32 %v1064_v11  ;;  %v1094_v11 = vpop.xlane.xlu0 %1093 }
 0x832   :  { %v812_v17 = vmul.f32 0.1, %v810_v12  ;;  %v813_v18 = vmul.f32 0.1, %v811_v5 }
 0x834   :  { %v814_v19 = vmax.f32 %v810_v12, %v812_v17  ;;  %v815_v20 = vmax.f32 %v811_v5, %v813_v18  ;;  %v1095_v12 = vrot.slane %v1094_v11, 4 }
 0x836   :  { %1265 = vmatprep.mubr.msk.f32.mxu0 %vm322_vm2, %v814_v19  ;;  %v1096_v5 = vadd.f32 %v1095_v12, %v1094_v11 }
 0x837   :  { %1266 = vmatmul.mubr.msk.f32.vlgmr.msra.gmra.mrb[10].mxu0 %vm322_vm2, %v815_v20 }
 0x838   :  { %v1097_v20 = vrot.slane %v1096_v5, 2 }
 0x83a   :  { %v1349_v21 = vpop.eup %1348 }
 0x83b   :  { %v1351_v22 = vpop.eup %1350  ;;  %v1069_v23 = vmul.f32 0.6931472, %v1349_v21 }
 0x83c   :  { %v1067_v24 = vmul.f32 0.6931472, %v1351_v22 }
 0x83d   :  { %v1071_v26 = vmax.f32 %v1069_v23, -100.0 }
 0x83e   :  { %v1070_v27 = vmax.f32 %v1067_v24, -100.0 }
 0x83f   :  { %v1073_v28 = vmul.f32 %v1071_v26, %v58_v25  ;;  %v1098_v26 = vadd.f32 %v1097_v20, %v1096_v5 }
 0x840   :  { %v1072_v6 = vmul.f32 %v1070_v27, %v57_v16 }
 0x841   :  { %v1075_v29 = vsub.f32 0.0, %v1073_v28 }
 0x842   :  { %v1074_v30 = vsub.f32 0.0, %v1072_v6 }
 0x843   :  { %v1077_v31 = vsel %vm66_vm0, %v1075_v29, 0.0  ;;  %v1099_v29 = vrot.slane %v1098_v26, 1 }
 0x844   :  { %v1076_v32 = vsel %vm66_vm0, %v1074_v30, 0.0 }
 0x845   :  { %v1078_v33 = vadd.f32 %v1077_v31, %v1076_v32  ;;  %v1100_v32 = vadd.f32 %v1099_v29, %v1098_v26 }
 0x90a   :  { %v1267_v35 = vpop.f32.mrb[10].mxu0 }
 0x90b   :  { %v903_v36 = vadd.f32 %v1267_v35, %v1144_v34  ;;  %v897_v37 = vpop.f32.mrb[11].mxu0 }
 0x90c   :  { %v898_v38 = vadd.f32 %v1144_v34, %v897_v37 }
 0x90d   :  { %v913_v39 = vand.u32 2147483647, %v903_v36  ;;  %v907_v52 = vmax.f32 %v903_v36, 0.0  ;;  %v909_v53 = vmul.f32 %v903_v36, %v1515_v4 }
 0x90e   :  { %v912_v40 = vand.u32 2147483647, %v898_v38  ;;  %v906_v56 = vmax.f32 %v898_v38, 0.0  ;;  %v908_v57 = vmul.f32 %v898_v38, %v1511_v2 }
 0x90f   :  { %v915_v41 = vsub.f32 0.0, %v913_v39  ;;  %v911_v63 = vsub.f32 %v907_v52, %v909_v53 }
 0x910   :  { %v914_v42 = vsub.f32 0.0, %v912_v40  ;;  %v910_v1 = vsub.f32 %v906_v56, %v908_v57 }
 0x911   :  { %v918_v43 = vmul.f32 1.442695, %v915_v41 }
 0x912   :  { %v916_v44 = vmul.f32 1.442695, %v914_v42 }
 0x913   :  { %1352 = vpow2.f32 %v918_v43 }
 0x914   :  { %1354 = vpow2.f32 %v916_v44 }
 0x91d   :  { %v1353_v45 = vpop.eup %1352 }
 0x91e   :  { %v1355_v46 = vpop.eup %1354  ;;  %v929_v47 = vadd.f32 1.0, %v1353_v45  ;;  %v932_v49 = vmul.f32 -0.5, %v1353_v45  ;;  %v935_v55 = vand.u32 2147483647, %v1353_v45 }
 0x91f   :  { %v920_v48 = vadd.f32 1.0, %v1355_v46  ;;  %v923_v50 = vmul.f32 -0.5, %v1355_v46  ;;  %v926_v58 = vand.u32 2147483647, %v1355_v46 }
 0x920   :  { %1356 = vlog2.f32 %v929_v47  ;;  %v933_v51 = vadd.f32 1.0, %v932_v49  ;;  %vm936_vm10 = vcmp.lt.f32.partialorder %v935_v55, 0.0004427343 }
 0x921   :  { %1358 = vlog2.f32 %v920_v48  ;;  %v924_v54 = vadd.f32 1.0, %v923_v50  ;;  %vm927_vm11 = vcmp.lt.f32.partialorder %v926_v58, 0.0004427343 }
 0x922   :  { %v934_v62 = vmul.f32 %v1353_v45, %v933_v51 }
 0x923   :  { %v925_v13 = vmul.f32 %v1355_v46, %v924_v54 }
 0x92a   :  { %v1357_v59 = vpop.eup %1356 }
 0x92b   :  { %v1359_v60 = vpop.eup %1358  ;;  %v931_v61 = vmul.f32 0.6931472, %v1357_v59 }
 0x92c   :  { %v922_v0 = vmul.f32 0.6931472, %v1359_v60 }
 0x92d   :  { %v937_v3 = vsel %vm936_vm10, %v934_v62, %v931_v61 }
 0x92e   :  { %v928_v7 = vsel %vm927_vm11, %v925_v13, %v922_v0  ;;  %v939_v8 = vadd.f32 %v937_v3, %v911_v63 }
 0x92f   :  { %v938_v4 = vadd.f32 %v928_v7, %v910_v1 }
 0x930   :  { %v941_v9 = vsel %vm66_vm0, %v939_v8, 0.0 }
 0x931   :  { %v940_v10 = vsel %vm66_vm0, %v938_v4, 0.0 }
 0x932   :  { %v942_v2 = vadd.f32 %v941_v9, %v940_v10 }
 0x934   :  { %943 = vadd.xlane.f32.xlu1 %v942_v2 }
 0x938   :  { %1079 = vadd.xlane.f32.xlu1 %v1078_v33  ;;  %v1104_v33 = vand.u32 127, %v222_v14 }
 0x93a   :  { %vm1108_vm13 = vcmp.eq.s32.totalorder %v1104_v33, 0  ;;  %vm1112_vm14 = vcmp.eq.s32.totalorder %v1104_v33, 1  ;;  %vm1117_vm0 = vcmp.eq.s32.totalorder %v1104_v33, 2 }
 0x93b   :  { %vm1109_vm15 = vmand %vm1107_vm12, %vm1108_vm13 }
 0x93c   :  { %vm1113_vm1 = vmand %vm1107_vm12, %vm1112_vm14 }
 0x93d   :  { %vm1118_vm2 = vmand %vm1107_vm12, %vm1117_vm0 }
 0x9c1   :  { %v944_v17 = vpop.xlane.xlu1 %943 }
 0x9c2   :  { %v945_v18 = vrot.slane %v944_v17, 4 }
 0x9c4   :  { %v946_v19 = vadd.f32 %v945_v18, %v944_v17 }
 0x9c5   :  { %v1080_v21 = vpop.xlane.xlu1 %1079 }
 0x9c6   :  { %v947_v22 = vrot.slane %v946_v19, 2  ;;  %v1081_v23 = vrot.slane %v1080_v21, 4 }
 0x9c8   :  { %v1082_v24 = vadd.f32 %v1081_v23, %v1080_v21  ;;  %v948_v25 = vadd.f32 %v947_v22, %v946_v19 }
 0x9ca   :  { %v1083_v16 = vrot.slane %v1082_v24, 2  ;;  %v949_v27 = vrot.slane %v948_v25, 1 }
 0x9cc   :  { %v1084_v28 = vadd.f32 %v1083_v16, %v1082_v24  ;;  %v950_v6 = vadd.f32 %v949_v27, %v948_v25 }
 0x9ce   :  { %1319 = vpush %v950_v6  ;;  %v1085_v30 = vrot.slane %v1084_v28, 1 }
 0x9d0   :  { %v1086_v31 = vadd.f32 %v1085_v30, %v1084_v28 }
 0x9d2   :  { %1321 = vpush %v1086_v31 }
 0x9d3   :  { %1323 = vpush %v1100_v32 }
 0x9ff   :  { %s1320_s2 = spop %1319 }
 0xa00   :  { %s952_s21 = smul.f32 0.0625, %s1320_s2 }
 0xa02   :  { %v1110_v34 = vstv %s952_s21 }
 0xa03   :  { %s1322_s22 = spop %1321  ;;  %v1111_v36 = vsel %vm1109_vm15, %v1110_v34, 0.0 }
 0xa04   :  { %s1088_s23 = smul.f32 0.0625, %s1322_s22  ;;  %s1324_s24 = spop %1323 }
 0xa05   :  { %s1102_s25 = smul.f32 0.0625, %s1324_s24 }
 0xa06   :  { %v1114_v35 = vstv %s1088_s23 }
 0xa07   :  { %v1115_v37 = vsel %vm1113_vm1, %v1114_v35, 0.0  ;;  %v1119_v38 = vstv %s1102_s25 }
 0xa08   :  { %v1116_v14 = vadd.f32 %v1115_v37, %v1111_v36  ;;  %v1120_v39 = vsel %vm1118_vm2, %v1119_v38, 0.0 }
 0xa0a   :  { %v1121_v40 = vadd.f32 %v1120_v39, %v1116_v14 }
 0xa0c   :  { %1122 = vst [vmem:[%s1587_s3] sm:$0xff] %v1121_v40 }
 0xa0d   :  { %1127 = vsyncpa [#allocation3], 1 }
 0xa0e   :  { %1128 = vsyncpa [#allocation5], 1 }

</bundles_post_ra>
